<compile_context>
chip_gen: v6e
topology: v6e:2x2x1
jax: 0.10.0
libtpu: 0.0.40
codegen_flags: <defaults>
</compile_context>

<pallas_src>
import numpy as np
import jax
import jax.numpy as jnp
from jax import lax
from jax.experimental import pallas as pl
from jax.experimental.pallas import tpu as pltpu

BINS = 256
HIST_CHUNK = 8            # channels per histogram MXU matmul (N = 8*256 = 2048 lanes)
# P-tile rows: 512 fills the 256-tall MXU on v6e/v7x and keeps the fused
# hist/grad working set inside v7x's 64 MiB VMEM.
# TODO(synk): on v5e/v6e (128 MiB VMEM) TP_MAX=1024 is better; re-derive per gen.
TP_MAX = 512
VMEM_LIMIT_BYTES = 32 * 1024 * 1024


def _round_up(x, m):
    return ((x + m - 1) // m) * m


def _compiler_params(semantics):
    return pltpu.CompilerParams(dimension_semantics=semantics,
                                vmem_limit_bytes=VMEM_LIMIT_BYTES)


# ----------------------------------------------------------------------------
# Pallas kernels
# ----------------------------------------------------------------------------
def _pyr_kernel(x_ref, m1_ref, m2t_ref, o_ref):
    """o[n] = m1 @ x[n] @ m2t for every plane n of the block (bf16 in, f32 acc).

    The right-multiply is merged into one (NB*I1, I2) @ (I2, O2) MXU matmul;
    the left-multiply is a short static loop.  m2 arrives pre-transposed."""
    nb, i1, i2 = x_ref.shape
    o2 = m2t_ref.shape[1]
    y = jnp.dot(x_ref[...].reshape(nb * i1, i2), m2t_ref[...],
                preferred_element_type=jnp.float32)
    y = y.astype(jnp.bfloat16).reshape(nb, i1, o2)
    m1 = m1_ref[...]
    for n in range(nb):
        o_ref[n] = jnp.dot(m1, y[n], preferred_element_type=jnp.float32)


def _plane_block(n, i1, i2, o1, o2, budget_bytes=4 << 20):
    """Largest divisor of n whose per-step blocks stay inside a VMEM byte budget."""
    per_plane = i1 * i2 * 2 + o1 * o2 * 4
    cap = max(1, budget_bytes // max(per_plane, 1))
    nb = 1
    for d in range(1, n + 1):
        if n % d == 0 and d <= cap:
            nb = d
    return nb


def pyr_apply(x, m1, m2t):
    """Apply m1 @ x[n] @ m2t to every plane of x (N, I1, I2); bf16 MXU inputs."""
    n, i1, i2 = x.shape
    o1, o2 = m1.shape[0], m2t.shape[1]
    nb = _plane_block(n, i1, i2, o1, o2)
    return pl.pallas_call(
        _pyr_kernel,
        out_shape=jax.ShapeDtypeStruct((n, o1, o2), jnp.float32),
        grid=(n // nb,),
        in_specs=[pl.BlockSpec((nb, i1, i2), lambda g: (g, 0, 0)),
                  pl.BlockSpec((o1, i1), lambda g: (0, 0)),
                  pl.BlockSpec((i2, o2), lambda g: (0, 0))],
        out_specs=pl.BlockSpec((nb, o1, o2), lambda g: (g, 0, 0)),
        compiler_params=_compiler_params(("parallel",)),
    )(x.astype(jnp.bfloat16), m1.astype(jnp.bfloat16), m2t.astype(jnp.bfloat16))


def _minmax_feat_kernel(cols_ref, w_ref, b_ref, feat_ref, mn_ref, mx_ref):
    """Pass 1: conv-as-matmul (bf16 MXU, f32 acc) + bias + ReLU.
    Writes bf16 feat back to HBM and accumulates per-channel min/max."""
    t = pl.program_id(0)
    pre = jnp.dot(cols_ref[...], w_ref[...],
                  preferred_element_type=jnp.float32) + b_ref[...]
    feat16 = jnp.maximum(pre, 0.0).astype(jnp.bfloat16)
    feat_ref[...] = feat16
    # min/max over the bf16-rounded values so pass-2 tie tests (feat == mn/mx)
    # and binning match bit-exactly against the feat that went to HBM.
    featr = feat16.astype(jnp.float32)
    tmn = jnp.min(featr, axis=0, keepdims=True)
    tmx = jnp.max(featr, axis=0, keepdims=True)

    @pl.when(t == 0)
    def _():
        mn_ref[...] = tmn
        mx_ref[...] = tmx

    @pl.when(t > 0)
    def _():
        mn_ref[...] = jnp.minimum(mn_ref[...], tmn)
        mx_ref[...] = jnp.maximum(mx_ref[...], tmx)


def feat_minmax(cols, w, b, tp):
    """(feat bf16 (P,Cpad), min (1,Cpad), max (1,Cpad)) for one layer."""
    p, k9 = cols.shape
    cpad = w.shape[1]
    return pl.pallas_call(
        _minmax_feat_kernel,
        out_shape=(jax.ShapeDtypeStruct((p, cpad), jnp.bfloat16),
                   jax.ShapeDtypeStruct((1, cpad), jnp.float32),
                   jax.ShapeDtypeStruct((1, cpad), jnp.float32)),
        grid=(p // tp,),
        in_specs=[pl.BlockSpec((tp, k9), lambda t: (t, 0)),      # cols, un-padded
                  pl.BlockSpec((k9, cpad), lambda t: (0, 0)),    # W  (bf16)
                  pl.BlockSpec((1, cpad), lambda t: (0, 0))],    # bias
        out_specs=(pl.BlockSpec((tp, cpad), lambda t: (t, 0)),
                   pl.BlockSpec((1, cpad), lambda t: (0, 0)),
                   pl.BlockSpec((1, cpad), lambda t: (0, 0))),
        compiler_params=_compiler_params(("arbitrary",)),
    )(cols, w, b)


def _make_hist_kernel(c_hist, c_real, coef, with_grad):
    """Pass 2: histogram (channel-chunked MXU reduction over P); optionally
    the analytic gradient tile and (at the last tile) the MipHistogramMSE loss."""
    n_chunks = c_hist // HIST_CHUNK
    inv_hist_n = 1.0 / float(c_real * BINS)
    inv_c = 1.0 / float(c_real)

    def kernel(feat_ref, mn_ref, mx_ref, *rest):
        if with_grad:
            (wt_ref, ht_ref, mnt_ref, mxt_ref,
             hist_ref, gcols_ref, loss_ref, onehot_ref) = rest
        else:
            hist_ref, onehot_ref = rest
        t = pl.program_id(0)
        nt = pl.num_programs(0)

        feat = feat_ref[...].astype(jnp.float32)            # (TP, Cpad)
        mn = mn_ref[...]
        mx = mx_ref[...]
        # Bin scale: divide -> EUP approx reciprocal, hoisted out of all loops.
        scale = BINS * pl.reciprocal(mx - mn + 1e-8, approx=True)
        # Bin indices are exact small integers -> bf16 compares (2x VPU on v6e/v7x).
        idx16 = jnp.clip(jnp.floor((feat - mn) * scale),
                         0.0, BINS - 1.0).astype(jnp.bfloat16)

        @pl.when(t == 0)
        def _():
            hist_ref[...] = jnp.zeros_like(hist_ref)

        bin_iota = lax.broadcasted_iota(jnp.int32, (1, BINS), 1).astype(jnp.bfloat16)
        ones_row = jnp.ones((1, feat_ref.shape[0]), jnp.bfloat16)
        # Channel-chunked histogram: stage HIST_CHUNK one-hot planes side by
        # side in VMEM, reduce over P with one wide MXU matmul per chunk and
        # accumulate a lane-dense (1, CHUNK*BINS) slice of the resident hist.
        for cb in range(n_chunks):
            for cc in range(HIST_CHUNK):
                ch = cb * HIST_CHUNK + cc
                onehot_ref[:, cc * BINS:(cc + 1) * BINS] = (
                    idx16[:, ch:ch + 1] == bin_iota).astype(jnp.bfloat16)
            part = jnp.dot(ones_row, onehot_ref[...],
                           preferred_element_type=jnp.float32)
            lo = cb * HIST_CHUNK * BINS
            hist_ref[:, lo:lo + HIST_CHUNK * BINS] += part

        if with_grad:
            mnt = mnt_ref[...]
            mxt = mxt_ref[...]
            # Analytic backward of the min/max MSE terms (hist term is 0 a.e.):
            # min/max subgradient -> ReLU mask -> conv^T as one MXU matmul.
            gmin = coef * (mn - mnt)
            gmax = coef * (mx - mxt)
            gfeat = (jnp.where(feat == mn, gmin, 0.0)
                     + jnp.where(feat == mx, gmax, 0.0))
            gfeat = jnp.where(feat > 0.0, gfeat, 0.0)
            gcols_ref[...] = jnp.dot(gfeat.astype(jnp.bfloat16), wt_ref[...],
                                     preferred_element_type=jnp.float32
                                     ).astype(gcols_ref.dtype)

            @pl.when(t == nt - 1)
            def _():
                dh = hist_ref[...] - ht_ref[...]
                dmn = mn - mnt
                dmx = mx - mxt
                # Sums normalised by the REAL channel count; padded lanes are
                # exact zeros on both sides so they do not perturb the loss.
                total = (jnp.sum(dh * dh) * inv_hist_n
                         + jnp.sum(dmn * dmn) * inv_c
                         + jnp.sum(dmx * dmx) * inv_c)
                loss_ref[...] = jnp.broadcast_to(total, (1, 1))

    return kernel


def feat_hist(feat, mn, mx, c_hist, tp):
    """Histogram only (used when preparing the style targets)."""
    p, cpad = feat.shape
    kern = _make_hist_kernel(c_hist, c_hist, 0.0, with_grad=False)
    return pl.pallas_call(
        kern,
        out_shape=jax.ShapeDtypeStruct((1, c_hist * BINS), jnp.float32),
        grid=(p // tp,),
        in_specs=[pl.BlockSpec((tp, cpad), lambda t: (t, 0)),
                  pl.BlockSpec((1, cpad), lambda t: (0, 0)),
                  pl.BlockSpec((1, cpad), lambda t: (0, 0))],
        out_specs=pl.BlockSpec((1, c_hist * BINS), lambda t: (0, 0)),
        scratch_shapes=[pltpu.VMEM((tp, HIST_CHUNK * BINS), jnp.bfloat16)],
        compiler_params=_compiler_params(("arbitrary",)),
    )(feat, mn, mx)


def feat_hist_grad_loss(feat, mn, mx, wt, ht, mnt, mxt, c_real, c_hist, coef, tp):
    """Fused histogram + MipHistogramMSE loss + analytic gradient (gcols, bf16)."""
    p, cpad = feat.shape
    k9p = wt.shape[1]
    kern = _make_hist_kernel(c_hist, c_real, coef, with_grad=True)
    return pl.pallas_call(
        kern,
        out_shape=(jax.ShapeDtypeStruct((1, c_hist * BINS), jnp.float32),
                   jax.ShapeDtypeStruct((p, k9p), jnp.bfloat16),
                   jax.ShapeDtypeStruct((1, 1), jnp.float32)),
        grid=(p // tp,),
        in_specs=[pl.BlockSpec((tp, cpad), lambda t: (t, 0)),      # feat (bf16)
                  pl.BlockSpec((1, cpad), lambda t: (0, 0)),       # global min
                  pl.BlockSpec((1, cpad), lambda t: (0, 0)),       # global max
                  pl.BlockSpec((cpad, k9p), lambda t: (0, 0)),     # W^T (bf16)
                  pl.BlockSpec((1, c_hist * BINS), lambda t: (0, 0)),  # hist target
                  pl.BlockSpec((1, cpad), lambda t: (0, 0)),       # min target
                  pl.BlockSpec((1, cpad), lambda t: (0, 0))],      # max target
        out_specs=(pl.BlockSpec((1, c_hist * BINS), lambda t: (0, 0)),
                   pl.BlockSpec((tp, k9p), lambda t: (t, 0)),
                   pl.BlockSpec((1, 1), lambda t: (0, 0))),
        scratch_shapes=[pltpu.VMEM((tp, HIST_CHUNK * BINS), jnp.bfloat16)],
        compiler_params=_compiler_params(("arbitrary",)),
    )(feat, mn, mx, wt, ht, mnt, mxt)


# ----------------------------------------------------------------------------
# Glue (reshapes, im2col/col2im, pyramid matrices) — plain JAX
# ----------------------------------------------------------------------------
def down_matrix(n):
    """5-tap binomial Gaussian blur + 2x decimation as an (n//2, n) matrix."""
    m = n // 2
    g = np.array([1., 4., 6., 4., 1.], np.float32) / 16.0
    a = np.zeros((m, n), np.float32)
    for i in range(m):
        for t in range(5):
            j = 2 * i + t - 2
            if 0 <= j < n:
                a[i, j] += g[t]
    return jnp.asarray(a)


def make_gaussian_pyramid(x, span, mips):
    # TODO(synk): nst utils.make_gaussian_pyramid span/zoom resampling simplified
    # to repeated 5-tap blur + 2x decimation (two MXU matmuls per plane).
    del span
    b, c, _, _ = x.shape
    pyr = [x.astype(jnp.float32)]
    cur = pyr[0]
    for _ in range(mips - 1):
        hh, ww = cur.shape[2], cur.shape[3]
        ah = down_matrix(hh)
        awt = down_matrix(ww).T                  # m2 pre-transposed (wrapper side)
        planes = cur.reshape(b * c, hh, ww)
        cur = pyr_apply(planes, ah, awt).reshape(b, c, hh // 2, ww // 2)
        pyr.append(cur)
    return pyr


def im2col(x):
    """(B, Cin, H, W) -> (B, H*W, Cin*9) bf16; SAME 3x3 patches, NOT lane-padded."""
    b, cin, h, w = x.shape
    xp = jnp.pad(x, ((0, 0), (0, 0), (1, 1), (1, 1)))
    pats = []
    for di in range(3):
        for dj in range(3):
            pats.append(xp[:, :, di:di + h, dj:dj + w])
    cols = jnp.stack(pats, axis=2)                    # (B, Cin, 9, H, W)
    cols = cols.reshape(b, cin * 9, h * w)
    cols = jnp.transpose(cols, (0, 2, 1))             # (B, H*W, Cin*9)
    return cols.astype(jnp.bfloat16)


def col2im(gcols, cin, h, w):
    """Adjoint of im2col: (H*W, K9P bf16) -> (1, Cin, H, W) f32; pad lanes dropped."""
    g = gcols[:, :cin * 9].astype(jnp.float32).reshape(h, w, cin, 3, 3)
    gp = jnp.zeros((cin, h + 2, w + 2), jnp.float32)
    for di in range(3):
        for dj in range(3):
            gp = gp.at[:, di:di + h, dj:dj + w].add(
                jnp.transpose(g[:, :, :, di, dj], (2, 0, 1)))
    return gp[:, 1:1 + h, 1:1 + w][None]


# ----------------------------------------------------------------------------
# StyleHistogramGuide (JAX / Pallas)
# ----------------------------------------------------------------------------
class StyleHistogramGuidePallas:
    def __init__(self, styles, vgg, style_mips, mip_weights, layers, layer_weights,
                 style_pyramid_span, style_zoom, weight, mask_layers=()):
        self.name = 'style histogram guide'
        self.styles = styles                     # list of {'tensor', 'target_map'}
        self.vgg = vgg                           # dict layer -> (W(Cout,Cin,3,3), b(Cout,))
        self.style_mips = style_mips
        self.mip_weights = mip_weights
        self.layers = layers
        self.mask_layers = list(mask_layers)
        self.layer_weight = layer_weights
        self.style_pyramid_span = style_pyramid_span
        self.zoom = style_zoom
        self.weight = weight
        self.target = []
        self.target_maps = []
        self._params_cache = {}
        # All synthetic layers convolve the raw image, so im2col depends only
        # on the mip and can be hoisted out of the layer loops.
        cins = {self.vgg[l][0].shape[1] for l in self.layers}
        assert len(cins) == 1, "im2col hoist assumes identical Cin for all layers"

    def _layer_params(self, layer):
        if layer in self._params_cache:
            return self._params_cache[layer]
        wf, bf = self.vgg[layer]
        cout, cin = wf.shape[0], wf.shape[1]
        cpad = _round_up(cout, 128)              # lane-dense feat/min/max/gfeat
        k9 = cin * 9                             # cols stay un-padded in HBM
        k9p = _round_up(k9, 128)                 # gcols output stays lane-dense
        c_hist = _round_up(cout, HIST_CHUNK)     # channels actually histogrammed
        w_flat = wf.reshape(cout, k9)
        w2 = (jnp.zeros((k9, cpad), jnp.float32)
              .at[:, :cout].set(w_flat.T).astype(jnp.bfloat16))   # (K9, Cpad)
        wt = (jnp.zeros((cpad, k9p), jnp.float32)
              .at[:cout, :k9].set(w_flat).astype(jnp.bfloat16))   # (Cpad, K9P)
        b2 = jnp.zeros((1, cpad), jnp.float32).at[0, :cout].set(bf)
        params = (w2, wt, b2, cout, cpad, cin, k9, k9p, c_hist)
        self._params_cache[layer] = params
        return params

    @staticmethod
    def _tile(p):
        if p <= TP_MAX:
            return p
        for tp in range(TP_MAX, 7, -8):
            if p % tp == 0:
                return tp
        # TODO(synk): ragged pixel counts would need a tail tile / row mask.
        raise AssertionError(f"no row tile found for P={p}")

    def _activations(self, cols, layer):
        """(hist, min, max) for one precomputed cols matrix at one layer."""
        w2, _, b2, _, _, _, _, _, c_hist = self._layer_params(layer)
        tp = self._tile(cols.shape[0])
        feat, mn, mx = feat_minmax(cols, w2, b2, tp)
        hist = feat_hist(feat, mn, mx, c_hist, tp)
        return hist, mn, mx

    def prepare(self):
        for style in self.styles:
            tm = style['target_map']
            if tm is not None and tm.size != 0:
                self.target_maps += [tm] * len(self.layers)
            else:
                self.target_maps += [None] * len(self.layers)
            # TODO(synk): style_zoom != 1.0 (utils.zoom_image) not implemented.
            pyr = make_gaussian_pyramid(style['tensor'], self.style_pyramid_span,
                                        self.style_mips)
            cols_pyr = [im2col(mip)[0] for mip in pyr]    # hoisted across layers
            for layer in self.layers:
                hist_pyr = [self._activations(cols, layer) for cols in cols_pyr]
                self.target.append(hist_pyr)

    def forward(self, opt_tensor, loss=0.0):
        b, c, h, w = opt_tensor.shape
        opt_pyr = make_gaussian_pyramid(opt_tensor, self.style_pyramid_span,
                                        self.style_mips)
        cols_pyr = [im2col(mip)[0] for mip in opt_pyr]    # hoisted across layers
        style_gradients = []
        for index, layer in enumerate(self.layers):
            target_pyr = self.target[index]
            layer_w = self.layer_weight[index]
            w2, wt, b2, cout, _, cin, _, _, c_hist = self._layer_params(layer)
            grad_img = jnp.zeros((b, c, h, w), jnp.float32)
            layer_loss = jnp.float32(0.0)
            for m, mip in enumerate(opt_pyr):
                hm, wm = mip.shape[2], mip.shape[3]
                cols = cols_pyr[m]
                tp = self._tile(cols.shape[0])
                h_t, mn_t, mx_t = target_pyr[m]
                mip_w = self.mip_weights[m]
                coef = self.weight * layer_w * mip_w * 2.0 / cout

                # pass 1: conv once -> feat (bf16) + global per-channel min/max
                feat, mn, mx = feat_minmax(cols, w2, b2, tp)
                # pass 2 (fused): histogram + MipHistogramMSE loss + analytic grad
                _hist, gcols, mip_loss = feat_hist_grad_loss(
                    feat, mn, mx, wt, h_t, mn_t, mx_t, cout, c_hist, coef, tp)
                layer_loss = layer_loss + mip_w * mip_loss[0, 0]

                gmip = col2im(gcols, cin, hm, wm)          # (1, C, hm, wm)
                # adjoint of the Gaussian pyramid back to full resolution
                for lvl in reversed(range(m)):
                    hl, wl = h >> lvl, w >> lvl
                    ah, aw = down_matrix(hl), down_matrix(wl)
                    planes = gmip.reshape(c, hl // 2, wl // 2)
                    gmip = pyr_apply(planes, ah.T, aw).reshape(1, c, hl, wl)
                grad_img = grad_img + gmip

            weighted_layer_loss = self.weight * layer_w * layer_loss
            loss = loss + weighted_layer_loss

            tm = self.target_maps[index]
            if tm is not None and layer in self.mask_layers:
                grad_img = grad_img * tm[0, 0][None, None, :, :]
            style_gradients.append(grad_img)
        # torch forward returns style_gradients and accumulates `loss` in place;
        # here we return both explicitly.
        return style_gradients, loss


# ----------------------------------------------------------------------------
if __name__ == "__main__":
    key = jax.random.PRNGKey(0)
    B, C, H, W = 1, 3, 32, 32                      # 32x32 -> 2 P-tiles at mip 0
    layers = ['r11', 'r21']
    layer_channels = {'r11': 8, 'r21': 16}

    k_style, k_opt, k_map, k_w = jax.random.split(key, 4)
    style_tensor = jax.random.uniform(k_style, (B, C, H, W), jnp.float32)
    opt_tensor = jax.random.uniform(k_opt, (B, C, H, W), jnp.float32)
    target_map = (jax.random.uniform(k_map, (1, 1, H, W), jnp.float32) > 0.5
                  ).astype(jnp.float32)

    # deterministic synthetic "VGG": one 3x3 conv + ReLU per requested layer
    vgg = {}
    for lk, layer in zip(jax.random.split(k_w, len(layers)), layers):
        cout = layer_channels[layer]
        kw, kb = jax.random.split(lk)
        wf = 0.1 * jax.random.normal(kw, (cout, C, 3, 3), jnp.float32)
        bf = 0.01 * jax.random.normal(kb, (cout,), jnp.float32)
        vgg[layer] = (wf, bf)

    styles = [{'tensor': style_tensor, 'target_map': target_map}]
    guide = StyleHistogramGuidePallas(
        styles=styles, vgg=vgg, style_mips=2, mip_weights=[1.0, 0.5],
        layers=layers, layer_weights=[1.0, 0.5], style_pyramid_span=1.0,
        style_zoom=1.0, weight=1.0, mask_layers=['r11'])

    guide.prepare()
    grads, total_loss = guide.forward(opt_tensor, loss=0.0)
    grads = [jax.block_until_ready(g) for g in grads]
    total_loss = jax.block_until_ready(total_loss)

    assert len(grads) == len(layers)
    assert all(g.shape == (B, C, H, W) for g in grads)
    assert all(bool(jnp.all(jnp.isfinite(g))) for g in grads)
    assert bool(jnp.isfinite(total_loss))
    print("KERNEL_OK")
</pallas_src>

<mosaic_0001>
module attributes {stable_mosaic.version = 11 : i64} {
  func.func @_pyr_kernel(%arg0: i32, %arg1: memref<3x32x32xbf16, #tpu.memory_space<vmem>>, %arg2: memref<16x32xbf16, #tpu.memory_space<vmem>>, %arg3: memref<32x16xbf16, #tpu.memory_space<vmem>>, %arg4: memref<3x16x16xf32, #tpu.memory_space<vmem>>) attributes {dimension_semantics = [#tpu.dimension_semantics<parallel>], iteration_bounds = array<i64: 1>, scalar_prefetch = 0 : i64, scratch_operands = 0 : i64, tpu.core_type = #tpu.core_type<tc>, window_params = [{transform_indices = @transform_0, window_bounds = array<i64: 3, 32, 32>}, {pipeline_mode = #tpu.pipeline_mode<synchronous>, transform_indices = @transform_1, window_bounds = array<i64: 16, 32>}, {pipeline_mode = #tpu.pipeline_mode<synchronous>, transform_indices = @transform_2, window_bounds = array<i64: 32, 16>}, {transform_indices = @transform_3, window_bounds = array<i64: 3, 16, 16>}]} {
    %c0 = arith.constant 0 : index
    %c0_0 = arith.constant 0 : index
    %c0_1 = arith.constant 0 : index
    %0 = vector.load %arg1[%c0, %c0_0, %c0_1] : memref<3x32x32xbf16, #tpu.memory_space<vmem>>, vector<3x32x32xbf16>
    %1 = vector.shape_cast %0 : vector<3x32x32xbf16> to vector<96x32xbf16>
    %c0_2 = arith.constant 0 : index
    %c0_3 = arith.constant 0 : index
    %2 = vector.load %arg3[%c0_2, %c0_3] : memref<32x16xbf16, #tpu.memory_space<vmem>>, vector<32x16xbf16>
    %cst = arith.constant dense<0.000000e+00> : vector<96x16xf32>
    %3 = tpu.matmul %1, %2, %cst {dimension_numbers = #tpu.dot_dimension_numbers<[1], [0], [0], [1], [0, 0, 1, 1], [], []>} : vector<96x32xbf16>, vector<32x16xbf16>, vector<96x16xf32> -> vector<96x16xf32>
    %4 = arith.truncf %3 : vector<96x16xf32> to vector<96x16xbf16>
    %5 = vector.shape_cast %4 : vector<96x16xbf16> to vector<3x32x16xbf16>
    %c0_4 = arith.constant 0 : index
    %c0_5 = arith.constant 0 : index
    %6 = vector.load %arg2[%c0_4, %c0_5] : memref<16x32xbf16, #tpu.memory_space<vmem>>, vector<16x32xbf16>
    %7 = vector.extract_strided_slice %5 {offsets = [0, 0, 0], sizes = [1, 32, 16], strides = [1, 1, 1]} : vector<3x32x16xbf16> to vector<1x32x16xbf16>
    %8 = vector.shape_cast %7 : vector<1x32x16xbf16> to vector<32x16xbf16>
    %cst_6 = arith.constant dense<0.000000e+00> : vector<16x16xf32>
    %9 = tpu.matmul %6, %8, %cst_6 {dimension_numbers = #tpu.dot_dimension_numbers<[1], [0], [0], [1], [0, 0, 1, 1], [], []>} : vector<16x32xbf16>, vector<32x16xbf16>, vector<16x16xf32> -> vector<16x16xf32>
    %c0_7 = arith.constant 0 : index
    %c0_8 = arith.constant 0 : index
    %c0_9 = arith.constant 0 : index
    %10 = vector.load %arg4[%c0_7, %c0_8, %c0_9] : memref<3x16x16xf32, #tpu.memory_space<vmem>>, vector<1x16x16xf32>
    %11 = vector.shape_cast %10 : vector<1x16x16xf32> to vector<16x16xf32>
    %12 = vector.shape_cast %9 : vector<16x16xf32> to vector<1x16x16xf32>
    tpu.vector_store %arg4[%c0_7, %c0_8, %c0_9], %12 {strides = array<i32>} : memref<3x16x16xf32, #tpu.memory_space<vmem>>, vector<1x16x16xf32>,
    %13 = vector.extract_strided_slice %5 {offsets = [1, 0, 0], sizes = [1, 32, 16], strides = [1, 1, 1]} : vector<3x32x16xbf16> to vector<1x32x16xbf16>
    %14 = vector.shape_cast %13 : vector<1x32x16xbf16> to vector<32x16xbf16>
    %cst_10 = arith.constant dense<0.000000e+00> : vector<16x16xf32>
    %15 = tpu.matmul %6, %14, %cst_10 {dimension_numbers = #tpu.dot_dimension_numbers<[1], [0], [0], [1], [0, 0, 1, 1], [], []>} : vector<16x32xbf16>, vector<32x16xbf16>, vector<16x16xf32> -> vector<16x16xf32>
    %c1 = arith.constant 1 : index
    %c0_11 = arith.constant 0 : index
    %c0_12 = arith.constant 0 : index
    %16 = vector.load %arg4[%c1, %c0_11, %c0_12] : memref<3x16x16xf32, #tpu.memory_space<vmem>>, vector<1x16x16xf32>
    %17 = vector.shape_cast %16 : vector<1x16x16xf32> to vector<16x16xf32>
    %18 = vector.shape_cast %15 : vector<16x16xf32> to vector<1x16x16xf32>
    tpu.vector_store %arg4[%c1, %c0_11, %c0_12], %18 {strides = array<i32>} : memref<3x16x16xf32, #tpu.memory_space<vmem>>, vector<1x16x16xf32>,
    %19 = vector.extract_strided_slice %5 {offsets = [2, 0, 0], sizes = [1, 32, 16], strides = [1, 1, 1]} : vector<3x32x16xbf16> to vector<1x32x16xbf16>
    %20 = vector.shape_cast %19 : vector<1x32x16xbf16> to vector<32x16xbf16>
    %cst_13 = arith.constant dense<0.000000e+00> : vector<16x16xf32>
    %21 = tpu.matmul %6, %20, %cst_13 {dimension_numbers = #tpu.dot_dimension_numbers<[1], [0], [0], [1], [0, 0, 1, 1], [], []>} : vector<16x32xbf16>, vector<32x16xbf16>, vector<16x16xf32> -> vector<16x16xf32>
    %c2 = arith.constant 2 : index
    %c0_14 = arith.constant 0 : index
    %c0_15 = arith.constant 0 : index
    %22 = vector.load %arg4[%c2, %c0_14, %c0_15] : memref<3x16x16xf32, #tpu.memory_space<vmem>>, vector<1x16x16xf32>
    %23 = vector.shape_cast %22 : vector<1x16x16xf32> to vector<16x16xf32>
    %24 = vector.shape_cast %21 : vector<16x16xf32> to vector<1x16x16xf32>
    tpu.vector_store %arg4[%c2, %c0_14, %c0_15], %24 {strides = array<i32>} : memref<3x16x16xf32, #tpu.memory_space<vmem>>, vector<1x16x16xf32>,
    return
  }
  func.func @transform_0(%arg0: i32) -> (i32, i32, i32) {
    %c0_i32 = arith.constant 0 : i32
    %c0_i32_0 = arith.constant 0 : i32
    %c0_i32_1 = arith.constant 0 : i32
    return %arg0, %c0_i32, %c0_i32_0 : i32, i32, i32
  }
  func.func @transform_1(%arg0: i32) -> (i32, i32) {
    %c0_i32 = arith.constant 0 : i32
    %c0_i32_0 = arith.constant 0 : i32
    %c0_i32_1 = arith.constant 0 : i32
    return %c0_i32, %c0_i32_0 : i32, i32
  }
  func.func @transform_2(%arg0: i32) -> (i32, i32) {
    %c0_i32 = arith.constant 0 : i32
    %c0_i32_0 = arith.constant 0 : i32
    %c0_i32_1 = arith.constant 0 : i32
    return %c0_i32, %c0_i32_0 : i32, i32
  }
  func.func @transform_3(%arg0: i32) -> (i32, i32, i32) {
    %c0_i32 = arith.constant 0 : i32
    %c0_i32_0 = arith.constant 0 : i32
    %c0_i32_1 = arith.constant 0 : i32
    return %arg0, %c0_i32, %c0_i32_0 : i32, i32, i32
  }
}

</mosaic_0001>

<bundles_post_ra>
// kernel: tpu_custom_call.1
= control target key start
LH: loop header
LB: loop body
LE: loop exit
PB: predicated region body
PF: predicated region fallthrough
CT: control target
= control target key end

     0   :  { %8 = vsyncpa [#allocation3], 0  ;;  %s550_s0 = inlined_call_operand.hbm [shape: bf16[3,32,32], index: 0, kind: input, shape index: {}]   ;;  %s551_s1 = inlined_call_operand.vmem [shape: bf16[16,32], index: 1, kind: input, shape index: {}]   ;;  %s552_s2 = inlined_call_operand.vmem [shape: bf16[32,16], index: 2, kind: input, shape index: {}]   ;;  %s553_s3 = inlined_call_operand.hbm [shape: f32[3,16,16], index: 3, kind: output, shape index: {}]  }
   0x1   :  { %9 = vsyncpa [#allocation4], 0  ;;  %s489_s12 = smov [#allocation2]  }
   0x2   :  { %s15_s13 = sshll.u32 %s489_s12, 4  ;;  %s16_s13 = int_to_ptr.vmem [resolvable:$true] %s15_s13 }
   0x3   :  { %s453_s14 = scalar_lea.vmem %s16_s13, 768  ;;  %p458_p1 = scmp.lt.s32.totalorder %s16_s13, %s16_s13 }
   0x4   :  { %p454_p0 = scmp.ne.s32.totalorder %s16_s13, %s453_s14  ;;  %p459_p2 = scmp.lt.s32.totalorder %s453_s14, %s453_s14 }
   0x6   :  { %p460_p3 = por %p459_p2, %p458_p1 }
   0x8   :  { %p461_p4 = pnand %p460_p3, %p454_p0 }
   0xa   :  { %464 = shalt.err (!%p461_p4)
}
   0xb   :  { %s490_s15 = smov 64   ;;  %s491_s16 = smov 4  }
   0xc   :  { %21 = dma.hbm_to_vmem [thread:$0]  %s550_s0, 768, %s16_s13, [#allocation3], %s490_s15, %s490_s15, %s491_s16  }
   0xd   :  { %485 = dma.done.wait [#allocation3], 768  }
   0xe   :  { %486 = vsyncadd [#allocation3], 4294966528  ;;  %v436_v0 = vld [vmem:[%s552_s2 + $0x8] sm:$0xff]   ;;  %v437_v1 = vld [vmem:[%s552_s2] sm:$0xff]   ;;  %vm88_vm0 = vcmask 261120   ;;  %v492_v8 = vmov 0.0  }
   0xf   :  { %388 = vmatprep.subr.bf16.mxu0 %v436_v0  ;;  %v438_v2 = vld [vmem:[#allocation2] sm:$0xff]   ;;  %v439_v3 = vld [vmem:[#allocation2 + $0x8] sm:$0xff]   ;;  %v440_v4 = vld [vmem:[#allocation2 + $0x10] sm:$0xff]   ;;  %404 = vmatprep.subr.bf16.mxu1 %v492_v8  ;;  %vm493_vm1 = vmmov 0   ;;  %vm245_vm2 = vcmask 130048  }
  0x10   :  { %389 = vmatpush3.bf16.msra.mxu0 %v436_v0  ;;  %392 = vmatprep.mubr.msk.bf16.mxu0 %vm88_vm0, %v438_v2  ;;  %v441_v5 = vld [vmem:[#allocation2 + $0x18] sm:$0xff]   ;;  %v442_v6 = vld [vmem:[#allocation2 + $0x20] sm:$0xff]   ;;  %v443_v7 = vld [vmem:[#allocation2 + $0x28] sm:$0xff]  }
  0x11   :  { %390 = vmatprep.subr.bf16.mxu0 %v437_v1  ;;  %408 = vmatprep.mubr.msk.bf16.mxu1 %vm493_vm1, %v492_v8  ;;  %v444_v17 = vld [vmem:[%s551_s1] sm:$0xff]   ;;  %s494_s1 = smov [#allocation5]  }
  0x12   :  { %s341_s23 = sshll.u32 %s494_s1, 4  ;;  %s342_s23 = int_to_ptr.vmem [resolvable:$true] %s341_s23 }
  0x13   :  { %s465_s24 = scalar_lea.vmem %s342_s23, 768  ;;  %p470_p6 = scmp.lt.s32.totalorder %s342_s23, %s342_s23 }
  0x14   :  { %391 = vmatpush3.bf16.msra.mxu0 %v437_v1  ;;  %p466_p5 = scmp.ne.s32.totalorder %s342_s23, %s465_s24  ;;  %p471_p7 = scmp.lt.s32.totalorder %s465_s24, %s465_s24 }
  0x16   :  { %p472_p8 = por %p471_p7, %p470_p6 }
  0x17   :  { %393 = vmatmul.mubr.msk.bf16.vlgmr.msra.gmra.mxu0 %vm88_vm0, %v439_v3 }
  0x18   :  { %396 = vmatprep.mubr.msk.bf16.mxu0 %vm88_vm0, %v440_v4  ;;  %p473_p9 = pnand %p472_p8, %p466_p5 }
  0x1f   :  { %397 = vmatmul.mubr.msk.bf16.gmra.mxu0 %vm88_vm0, %v441_v5 }
  0x20   :  { %400 = vmatprep.mubr.msk.bf16.mxu0 %vm88_vm0, %v442_v6 }
  0x27   :  { %401 = vmatmul.mubr.msk.bf16.gmra.mxu0 %vm88_vm0, %v443_v7 }
  0xd7   :  { %v394_v9 = vpop.f32.mrf.mxu0 }
  0xd9   :  { %v141_v10 = vpop.f32.mrf.mxu0 }
  0xdb   :  { %v395_v11 = vpop.f32.mrf.mxu0 }
  0xdc   :  { %v189_v12 = vpack.c.bf16 %v395_v11, %v394_v9 }
  0xdd   :  { %v144_v13 = vpop.f32.mrf.mxu0 }
  0xde   :  { %405 = vmatpush3.bf16.msra.mxu1 %v189_v12  ;;  %v188_v15 = vpack.c.bf16 %v144_v13, %v141_v10 }
  0xdf   :  { %v398_v14 = vpop.f32.mrf.mxu0  ;;  %406 = vmatprep.subr.bf16.mxu1 %v492_v8 }
  0xe1   :  { %v157_v16 = vpop.f32.mrf.mxu0 }
  0xe2   :  { %407 = vmatpush3.bf16.msra.mxu1 %v188_v15 }
  0xe3   :  { %v399_v18 = vpop.f32.mrf.mxu0  ;;  %412 = vmatprep.subr.bf16.mxu1 %v492_v8 }
  0xe4   :  { %v191_v19 = vpack.c.bf16 %v399_v18, %v398_v14 }
  0xe5   :  { %v160_v20 = vpop.f32.mrf.mxu0  ;;  %409 = vmatmul.mubr.msk.bf16.vlgmr.msra.gmra.mxu1 %vm88_vm0, %v444_v17 }
  0xe6   :  { %413 = vmatpush3.bf16.msra.mxu1 %v191_v19  ;;  %416 = vmatprep.mubr.msk.bf16.mxu1 %vm493_vm1, %v492_v8  ;;  %v190_v22 = vpack.c.bf16 %v160_v20, %v157_v16 }
  0xe7   :  { %v402_v21 = vpop.f32.mrf.mxu0  ;;  %414 = vmatprep.subr.bf16.mxu1 %v492_v8 }
  0xe9   :  { %v173_v23 = vpop.f32.mrf.mxu0 }
  0xea   :  { %415 = vmatpush3.bf16.msra.mxu1 %v190_v22 }
  0xeb   :  { %v403_v24 = vpop.f32.mrf.mxu0  ;;  %420 = vmatprep.subr.bf16.mxu1 %v492_v8 }
  0xec   :  { %v193_v25 = vpack.c.bf16 %v403_v24, %v402_v21 }
  0xed   :  { %v176_v26 = vpop.f32.mrf.mxu0  ;;  %417 = vmatmul.mubr.msk.bf16.vlgmr.msra.gmra.mxu1 %vm88_vm0, %v444_v17 }
  0xee   :  { %421 = vmatpush3.bf16.msra.mxu1 %v193_v25  ;;  %424 = vmatprep.mubr.msk.bf16.mxu1 %vm493_vm1, %v492_v8  ;;  %v192_v27 = vpack.c.bf16 %v176_v26, %v173_v23 }
  0xef   :  { %422 = vmatprep.subr.bf16.mxu1 %v492_v8 }
  0xf2   :  { %423 = vmatpush3.bf16.msra.mxu1 %v192_v27 }
  0xf5   :  { %425 = vmatmul.mubr.msk.bf16.vlgmr.msra.gmra.mxu1 %vm88_vm0, %v444_v17 }
 0x1a5   :  { %v238_v28 = vpop.f32.mrf.mxu1 }
 0x1a6   :  { %246 = vst.msk [vmem:[#allocation5] sm:$0xff] %vm245_vm2, %v238_v28 }
 0x1a7   :  { %v410_v29 = vpop.f32.mrf.mxu1 }
 0x1a9   :  { %v241_v30 = vpop.f32.mrf.mxu1 }
 0x1aa   :  { %247 = vst.msk [vmem:[#allocation5 + $0x8] sm:$0xff] %vm245_vm2, %v241_v30 }
 0x1ab   :  { %v411_v31 = vpop.f32.mrf.mxu1 }
 0x1ad   :  { %v282_v32 = vpop.f32.mrf.mxu1 }
 0x1ae   :  { %290 = vst.msk [vmem:[#allocation5 + $0x10] sm:$0xff] %vm245_vm2, %v282_v32 }
 0x1af   :  { %v418_v33 = vpop.f32.mrf.mxu1 }
 0x1b1   :  { %v285_v34 = vpop.f32.mrf.mxu1 }
 0x1b2   :  { %291 = vst.msk [vmem:[#allocation5 + $0x18] sm:$0xff] %vm245_vm2, %v285_v34 }
 0x1b3   :  { %v419_v35 = vpop.f32.mrf.mxu1 }
 0x1b5   :  { %v326_v36 = vpop.f32.mrf.mxu1 }
 0x1b6   :  { %334 = vst.msk [vmem:[#allocation5 + $0x20] sm:$0xff] %vm245_vm2, %v326_v36 }
 0x1b7   :  { %v426_v37 = vpop.f32.mrf.mxu1 }
 0x1b9   :  { %v329_v38 = vpop.f32.mrf.mxu1 }
 0x1ba   :  { %335 = vst.msk [vmem:[#allocation5 + $0x28] sm:$0xff] %vm245_vm2, %v329_v38 }
 0x1bb   :  { %v427_v39 = vpop.f32.mrf.mxu1 }
 0x1bc   :  { %476 = shalt.err (!%p473_p9)
}
 0x1bd   :  { %s495_s25 = smov 128   ;;  %s496_s26 = smov 8  }
 0x1be   :  { %347 = dma.vmem_to_hbm [thread:$0]  %s342_s23, 768, %s553_s3, [#allocation4], %s495_s25, %s495_s25, %s496_s26  }
 0x1bf   :  { %487 = dma.done.wait [#allocation4], 768  }
 0x1c0   :  { %488 = vsyncadd [#allocation4], 4294966528 }
 0x1c1   :  { %351 = vsyncpa [#allocation3], 1 }
 0x1c2   :  { %352 = vsyncpa [#allocation4], 1 }

</bundles_post_ra>
